<compile_context>
chip_gen: v7x
topology: tpu7x:2x2x1
jax: 0.10.0
libtpu: 0.0.40
codegen_flags: <defaults>
</compile_context>

<pallas_src>
import functools

import numpy as np
import jax
import jax.numpy as jnp
from jax import lax
from jax.experimental import pallas as pl
from jax.experimental.pallas import tpu as pltpu

STAGE_STRIDES = (1, 2, 2, 2)
STAGE_WIDTHS = (64, 128, 256, 512)
STAGE_BLOCKS = (3, 4, 6, 3)

_NEG = -3.0e38                      # bf16/f32-safe "-inf" sentinel for max-pooling


def _round_up(x, m):
  return ((x + m - 1) // m) * m


def _cdiv(a, b):
  return -(-a // b)


def _detect_vmem_cap():
  try:
    return int(pltpu.get_tpu_info().vmem_capacity_bytes)
  except Exception:
    return 64 * 1024 * 1024         # conservative (v7x-sized) fallback


_VMEM_CAP = _detect_vmem_cap()
# Never claim all of physical VMEM (Mosaic internal scratch / semaphores need headroom).
_VMEM_LIMIT = min((_VMEM_CAP * 3) // 4, 100 * 1024 * 1024)
_BIG_VMEM = _VMEM_CAP > 64 * 1024 * 1024
_ROW_BUDGET = 6 * 1024 * 1024 if _BIG_VMEM else 2 * 1024 * 1024
_ROW_CAP = 1024 if _BIG_VMEM else 512


def _cparams(*sems):
  return pltpu.CompilerParams(dimension_semantics=sems,
                              vmem_limit_bytes=_VMEM_LIMIT)


def _row_tile(m, c, bytes_per=4):
  """Row tile (multiple of 8) targeting ~_ROW_BUDGET bytes per (rows, C) block."""
  t = max(8, _ROW_BUDGET // max(1, c * bytes_per))
  t = min(_ROW_CAP, t, _round_up(m, 8))
  return max(8, (t // 8) * 8)


# --------------------------------------------------------------------------
# Tiled matmul (+bias) kernel
# --------------------------------------------------------------------------
def _matmul_kernel_nk1(a_ref, b_ref, bias_ref, o_ref):
  o_ref[...] = (jnp.dot(a_ref[...], b_ref[...],
                        preferred_element_type=jnp.float32)
                + bias_ref[...]).astype(o_ref.dtype)


def _matmul_kernel(a_ref, b_ref, bias_ref, o_ref, acc_ref):
  k = pl.program_id(2)
  part = jnp.dot(a_ref[...], b_ref[...], preferred_element_type=jnp.float32)

  @pl.when(k == 0)
  def _():
    acc_ref[...] = part + bias_ref[...]

  @pl.when(k > 0)
  def _():
    acc_ref[...] += part

  @pl.when(k == pl.num_programs(2) - 1)
  def _():
    o_ref[...] = acc_ref[...].astype(o_ref.dtype)


def matmul_bias(a, b, bias=None, use_bf16=True, out_dtype=jnp.float32):
  """a:(M,K) @ b:(K,N) + bias -> (M,N); M/N/K-tiled Pallas matmul, f32 accumulation."""
  m, k = a.shape
  _, n = b.shape
  if bias is None:
    bias = jnp.zeros((n,), jnp.float32)

  np_ = _round_up(n, 128)                       # lane-dense output stores
  tn = 256 if np_ % 256 == 0 else 128
  if m <= 256:
    mp = _round_up(m, 8)
    tm = mp
  else:
    tm = 256
    mp = _round_up(m, tm)
  if k <= 2048:                                 # single K tile for all nets' 1x1 convs
    tk, kp = k, k
  else:
    tk = 2048 if (mp <= 64 and k >= 4096) else 1024
    kp = _round_up(k, tk)
  nk = kp // tk

  if use_bf16:                                  # bf16 MXU inputs, f32 accumulation
    a = a.astype(jnp.bfloat16)
    b = b.astype(jnp.bfloat16)
  if (mp, kp) != (m, k):
    a = jnp.pad(a, ((0, mp - m), (0, kp - k)))
  if (kp, np_) != (k, n):
    b = jnp.pad(b, ((0, kp - k), (0, np_ - n)))
  bias2 = jnp.pad(bias.astype(jnp.float32), (0, np_ - n)).reshape(1, np_)

  if nk == 1:
    out = pl.pallas_call(
        _matmul_kernel_nk1,
        out_shape=jax.ShapeDtypeStruct((mp, np_), out_dtype),
        grid=(mp // tm, np_ // tn),
        in_specs=[pl.BlockSpec((tm, tk), lambda i, j: (i, 0)),
                  pl.BlockSpec((tk, tn), lambda i, j: (0, j)),
                  pl.BlockSpec((1, tn), lambda i, j: (0, j))],
        out_specs=pl.BlockSpec((tm, tn), lambda i, j: (i, j)),
        compiler_params=_cparams("parallel", "parallel"),
    )(a, b, bias2)
  else:
    out = pl.pallas_call(
        _matmul_kernel,
        out_shape=jax.ShapeDtypeStruct((mp, np_), out_dtype),
        grid=(mp // tm, np_ // tn, nk),
        in_specs=[pl.BlockSpec((tm, tk), lambda i, j, kk: (i, kk)),
                  pl.BlockSpec((tk, tn), lambda i, j, kk: (kk, j)),
                  pl.BlockSpec((1, tn), lambda i, j, kk: (0, j))],
        out_specs=pl.BlockSpec((tm, tn), lambda i, j, kk: (i, j)),
        scratch_shapes=[pltpu.VMEM((tm, tn), jnp.float32)],
        compiler_params=_cparams("parallel", "parallel", "arbitrary"),
    )(a, b, bias2)
  if (mp, np_) != (m, n):
    out = out[:m, :n]
  return out


# --------------------------------------------------------------------------
# Direct k x k convolution kernel (whole-slab per-tap matmuls, no row loop)
# --------------------------------------------------------------------------
def _conv_kernel(x_ref, w_ref, b_ref, o_ref, acc_ref, *, kh, kw, ho, wo_p):
  # x_ref:  (hin, win_p, tcin) bf16      (win_p = wo_p + kw - 1, wo_p % 8 == 0)
  # w_ref:  (kh*kw, tcin, tcout) bf16
  # b_ref:  (1, tcout) f32
  # o_ref:  (ho*wo_p, tcout) out_dtype   (resident across the ci grid axis)
  # acc_ref:(ho*wo_p, tcout) f32 scratch
  ci = pl.program_id(2)
  tcin = x_ref.shape[-1]

  part = None
  for dy in range(kh):
    for dx in range(kw):
      xs = x_ref[dy:dy + ho, dx:dx + wo_p, :]          # bf16 pre-sliced window
      xs = xs.reshape(ho * wo_p, tcin)                 # wo_p % 8 == 0 -> free collapse
      d = jnp.dot(xs, w_ref[dy * kw + dx], preferred_element_type=jnp.float32)
      part = d if part is None else part + d

  @pl.when(ci == 0)
  def _():
    acc_ref[...] = part + b_ref[...]

  @pl.when(ci > 0)
  def _():
    acc_ref[...] += part

  @pl.when(ci == pl.num_programs(2) - 1)
  def _():
    o_ref[...] = acc_ref[...].astype(o_ref.dtype)


def _conv_direct(x_all, w_all, bias, ho, wo, kh, kw, out_dtype):
  """Stride-1 direct conv; taps accumulated in-kernel, Cin tiled on the grid."""
  n, hin, win, cin_all = x_all.shape
  kk, _, cout = w_all.shape

  wo_p = _round_up(wo, 8)                       # 8-aligned rows -> free reshapes
  win_p = wo_p + kw - 1                         # >= win by construction

  if cin_all <= 512:
    tcin, cin_p = cin_all, cin_all
  else:
    tcin = 512
    cin_p = _round_up(cin_all, tcin)
  cout_p = _round_up(cout, 128)                 # lane-dense (unmasked) output stores
  tcout = cout_p if cout_p <= 256 else 256

  x_all = x_all.astype(jnp.bfloat16)
  if (win_p, cin_p) != (win, cin_all):
    x_all = jnp.pad(x_all, ((0, 0), (0, 0), (0, win_p - win),
                            (0, cin_p - cin_all)))
  w_all = w_all.astype(jnp.bfloat16)
  if (cin_p, cout_p) != (cin_all, cout):
    w_all = jnp.pad(w_all, ((0, 0), (0, cin_p - cin_all), (0, cout_p - cout)))
  if bias is None:
    bias = jnp.zeros((cout_p,), jnp.float32)
  else:
    bias = jnp.pad(bias.astype(jnp.float32), (0, cout_p - cout))
  bias2 = bias.reshape(1, cout_p)

  out = pl.pallas_call(
      functools.partial(_conv_kernel, kh=kh, kw=kw, ho=ho, wo_p=wo_p),
      out_shape=jax.ShapeDtypeStruct((n, ho * wo_p, cout_p), out_dtype),
      grid=(n, cout_p // tcout, cin_p // tcin),
      in_specs=[
          pl.BlockSpec((None, hin, win_p, tcin), lambda b, co, ci: (b, 0, 0, ci)),
          pl.BlockSpec((kk, tcin, tcout), lambda b, co, ci: (0, ci, co)),
          pl.BlockSpec((1, tcout), lambda b, co, ci: (0, co)),
      ],
      out_specs=pl.BlockSpec((None, ho * wo_p, tcout),
                             lambda b, co, ci: (b, 0, co)),
      scratch_shapes=[pltpu.VMEM((ho * wo_p, tcout), jnp.float32)],
      compiler_params=_cparams("parallel", "parallel", "arbitrary"),
  )(x_all, w_all, bias2)

  out = out.reshape(n, ho, wo_p, cout_p)
  if (wo_p, cout_p) != (wo, cout):
    out = out[:, :, :wo, :cout]
  return out


def conv2d(x, w, b=None, stride=1, pad=0, out_dtype=jnp.bfloat16):
  """x: NHWC; w: (Cout, Cin, kh, kw) PyTorch layout; returns NHWC (bf16 by default)."""
  cout, cin, kh, kw = w.shape
  n, h, wd, _ = x.shape

  if kh == 1 and kw == 1:                       # pointwise conv -> tiled matmul
    if stride > 1:
      x = x[:, ::stride, ::stride, :]
    nh, nw = x.shape[1], x.shape[2]
    y = matmul_bias(x.reshape(n * nh * nw, cin),
                    jnp.transpose(w.reshape(cout, cin)), b, out_dtype=out_dtype)
    return y.reshape(n, nh, nw, cout)

  xp = jnp.pad(x, ((0, 0), (pad, pad), (pad, pad), (0, 0)))
  hp, wp = h + 2 * pad, wd + 2 * pad
  ho = (hp - kh) // stride + 1
  wo = (wp - kw) // stride + 1

  # Stride-2 convs are folded to stride-1 via phase (space-to-depth) decomposition;
  # phases are concatenated on the channel axis so one kernel call accumulates all.
  if stride == 1:
    phases = [(xp, w, kh, kw)]
  else:
    phases = []
    for py in range(stride):
      for px in range(stride):
        wph = w[:, :, py::stride, px::stride]
        phases.append((xp[:, py::stride, px::stride, :], wph,
                       wph.shape[2], wph.shape[3]))
  ka = max(p[2] for p in phases)
  kb = max(p[3] for p in phases)
  hin, win = ho + ka - 1, wo + kb - 1

  xs, ws = [], []
  for xph, wph, kha, kwb in phases:
    xph = xph[:, :hin, :win, :]
    dh, dw = hin - xph.shape[1], win - xph.shape[2]
    if dh > 0 or dw > 0:
      xph = jnp.pad(xph, ((0, 0), (0, dh), (0, dw), (0, 0)))
    if kha < ka or kwb < kb:
      wph = jnp.pad(wph, ((0, 0), (0, 0), (0, ka - kha), (0, kb - kwb)))
    xs.append(xph)
    ws.append(wph)
  x_all = xs[0] if len(xs) == 1 else jnp.concatenate(xs, axis=-1)
  w_all = ws[0] if len(ws) == 1 else jnp.concatenate(ws, axis=1)
  w_all = jnp.transpose(w_all, (2, 3, 1, 0)).reshape(ka * kb, -1, cout)
  return _conv_direct(x_all, w_all, b, ho, wo, ka, kb, out_dtype)


# --------------------------------------------------------------------------
# Max-pool 3x3 stride 2 pad 1 (phase-decomposed, fully unrolled shifted maxima)
# --------------------------------------------------------------------------
def _maxpool_kernel(x_ref, o_ref, *, taps, win, ho, wo):
  m = None
  for p, (na, nb) in enumerate(taps):
    for a in range(na):
      for b in range(nb):
        v = x_ref[a:a + ho, p * win + b:p * win + b + wo, :]
        m = v if m is None else jnp.maximum(m, v)
  o_ref[...] = m


def maxpool_3x3_s2_p1(x):
  n, h, w, c = x.shape
  xp = jnp.pad(x, ((0, 0), (1, 1), (1, 1), (0, 0)), constant_values=_NEG)
  hp, wp = h + 2, w + 2
  ho, wo = (hp - 3) // 2 + 1, (wp - 3) // 2 + 1
  hin, win = ho + 1, wo + 1

  cols, taps = [], []
  for py in range(2):
    for px in range(2):
      xph = xp[:, py::2, px::2, :][:, :hin, :win, :]
      dh, dw = hin - xph.shape[1], win - xph.shape[2]
      if dh > 0 or dw > 0:
        xph = jnp.pad(xph, ((0, 0), (0, dh), (0, dw), (0, 0)),
                      constant_values=_NEG)
      cols.append(xph)
      taps.append(((3 - 1 - py) // 2 + 1, (3 - 1 - px) // 2 + 1))
  xcat = jnp.concatenate(cols, axis=2)                       # (n, hin, 4*win, c)

  return pl.pallas_call(
      functools.partial(_maxpool_kernel, taps=tuple(taps), win=win, ho=ho, wo=wo),
      out_shape=jax.ShapeDtypeStruct((n, ho, wo, c), x.dtype),
      grid=(n,),
      in_specs=[pl.BlockSpec((None, hin, 4 * win, c), lambda i: (i, 0, 0, 0))],
      out_specs=pl.BlockSpec((None, ho, wo, c), lambda i: (i, 0, 0, 0)),
      compiler_params=_cparams("parallel"),
  )(xcat)


# --------------------------------------------------------------------------
# BatchNorm (training-mode batch stats, per-group): tiled reduction + fused apply.
# The leading grid axis is always >= 2 so the stats reduction can split across the
# two TensorCores on v7x.
# --------------------------------------------------------------------------
def _bn_stats_kernel(x_ref, sum_ref, sq_ref):
  @pl.when(pl.program_id(1) == 0)
  def _():
    sum_ref[...] = jnp.zeros_like(sum_ref)
    sq_ref[...] = jnp.zeros_like(sq_ref)

  xv = x_ref[...].astype(jnp.float32)
  sum_ref[...] += jnp.sum(xv, axis=0, keepdims=True)
  sq_ref[...] += jnp.sum(xv * xv, axis=0, keepdims=True)


def _bn_apply_kernel(*refs, relu, has_res):
  if has_res:
    x_ref, r_ref, sc_ref, sh_ref, o_ref = refs
  else:
    x_ref, sc_ref, sh_ref, o_ref = refs
    r_ref = None
  y = x_ref[...].astype(jnp.float32) * sc_ref[...] + sh_ref[...]
  if r_ref is not None:
    y = y + r_ref[...].astype(jnp.float32)
  if relu:
    y = jnp.maximum(y, 0.0)
  o_ref[...] = y.astype(o_ref.dtype)


def batchnorm2d(x, gamma, beta, relu=False, residual=None, groups=1,
                eps=1e-5, out_dtype=jnp.bfloat16):
  """BatchNorm2d with per-group (per-stream) batch statistics; optional fused
  residual-add + ReLU epilogue."""
  n, h, w, c = x.shape
  g = groups
  s = 2 if g == 1 else 1                         # keep >= 2 leading grid programs
  gs = g * s
  mg = (n // g) * h * w                          # rows per group
  bpe = 2 if x.dtype == jnp.bfloat16 else 4
  rows = _cdiv(mg, s)
  t = _row_tile(rows, c, bpe)
  mps = _round_up(rows, t)
  mpg = mps * s

  def prep(a):
    ag = a.reshape(g, mg, c)
    if mpg != mg:
      ag = jnp.pad(ag, ((0, 0), (0, mpg - mg), (0, 0)))
    return ag.reshape(gs, mps, c)

  xg = prep(x)
  grid = (gs, mps // t)
  blk = pl.BlockSpec((None, t, c), lambda i, j: (i, j, 0))
  vec = pl.BlockSpec((None, 1, c), lambda i, j: (i, 0, 0))

  ssum, ssq = pl.pallas_call(
      _bn_stats_kernel,
      out_shape=(jax.ShapeDtypeStruct((gs, 1, c), jnp.float32),
                 jax.ShapeDtypeStruct((gs, 1, c), jnp.float32)),
      grid=grid,
      in_specs=[blk],
      out_specs=(vec, vec),
      compiler_params=_cparams("parallel", "arbitrary"),
  )(xg)

  # tiny per-channel glue (zeros padding contributes nothing to sum/sumsq)
  s_g = ssum.reshape(g, s, c).sum(axis=1)
  q_g = ssq.reshape(g, s, c).sum(axis=1)
  mean = s_g / mg
  var = jnp.maximum(q_g / mg - mean * mean, 0.0)
  scale = gamma[None, :].astype(jnp.float32) * lax.rsqrt(var + eps)
  shift = beta[None, :].astype(jnp.float32) - mean * scale
  sc = jnp.broadcast_to(scale[:, None, :], (g, s, c)).reshape(gs, 1, c)
  sh = jnp.broadcast_to(shift[:, None, :], (g, s, c)).reshape(gs, 1, c)

  has_res = residual is not None
  ins = [xg]
  in_specs = [blk]
  if has_res:
    ins.append(prep(residual))
    in_specs.append(blk)
  ins += [sc, sh]
  in_specs += [vec, vec]

  out = pl.pallas_call(
      functools.partial(_bn_apply_kernel, relu=relu, has_res=has_res),
      out_shape=jax.ShapeDtypeStruct((gs, mps, c), out_dtype),
      grid=grid,
      in_specs=in_specs,
      out_specs=blk,
      compiler_params=_cparams("parallel", "parallel"),
  )(*ins)
  return out.reshape(g, mpg, c)[:, :mg].reshape(n, h, w, c)


# --------------------------------------------------------------------------
# Attention merge (sigmoid weights, per-stream weighted sum) — row tiled
# --------------------------------------------------------------------------
def _att_merge_kernel(s_ref, r_ref, a_ref, m_ref, w_ref):
  wgt = jax.nn.sigmoid(s_ref[...].astype(jnp.float32))
  w_ref[...] = wgt
  merged = (r_ref[...].astype(jnp.float32) * wgt[:, 0:1]
            + a_ref[...].astype(jnp.float32) * wgt[:, 1:2])
  m_ref[...] = merged.astype(m_ref.dtype)


def attention_merge(scores, rgb_f, aux_f):
  n, h, w, c = rgb_f.shape
  m = n * h * w
  t = _row_tile(m, c, 2)
  mp = _round_up(m, t)
  sf, rf, af = scores.reshape(m, 2), rgb_f.reshape(m, c), aux_f.reshape(m, c)
  if mp != m:
    sf = jnp.pad(sf, ((0, mp - m), (0, 0)))
    rf = jnp.pad(rf, ((0, mp - m), (0, 0)))
    af = jnp.pad(af, ((0, mp - m), (0, 0)))
  merged, wts = pl.pallas_call(
      _att_merge_kernel,
      out_shape=(jax.ShapeDtypeStruct((mp, c), jnp.bfloat16),
                 jax.ShapeDtypeStruct((mp, 2), jnp.float32)),
      grid=(mp // t,),
      in_specs=[pl.BlockSpec((t, 2), lambda i: (i, 0)),
                pl.BlockSpec((t, c), lambda i: (i, 0)),
                pl.BlockSpec((t, c), lambda i: (i, 0))],
      out_specs=(pl.BlockSpec((t, c), lambda i: (i, 0)),
                 pl.BlockSpec((t, 2), lambda i: (i, 0))),
      compiler_params=_cparams("parallel"),
  )(sf, rf, af)
  return merged[:m].reshape(n, h, w, c), wts[:m].reshape(n, h, w, 2)


# --------------------------------------------------------------------------
# x32 bilinear upsample (align_corners=True), output written lane-dense in NCHW
# --------------------------------------------------------------------------
def _interp_matrix(n_in, n_out):
  a = np.zeros((n_out, n_in), dtype=np.float32)
  if n_in == 1:
    a[:, 0] = 1.0
  else:
    scale = (n_in - 1) / (n_out - 1)
    for i in range(n_out):
      src = i * scale
      i0 = min(int(np.floor(src)), n_in - 2)
      frac = src - i0
      a[i, i0] += 1.0 - frac
      a[i, i0 + 1] += frac
  return jnp.asarray(a)


def upsample_x32_to_nchw(y):
  """(S, N, Hf, Wf, C) -> (S, N, C, 32*Hf, 32*Wf). Separable matmul upsample; all
  transposes act on the 32x-smaller intermediate and the final (large) write is NCHW."""
  s, n, hf, wf, c = y.shape
  ho, wo = 32 * hf, 32 * wf
  ah = _interp_matrix(hf, ho)
  aw = _interp_matrix(wf, wo)
  t = jnp.transpose(y, (2, 0, 1, 4, 3)).reshape(hf, s * n * c * wf)
  t = matmul_bias(ah, t, out_dtype=jnp.bfloat16)             # (Ho, S*N*C*Wf)
  t = t.reshape(ho, s, n, c, wf)
  t = jnp.transpose(t, (1, 2, 3, 0, 4)).reshape(s * n * c * ho, wf)
  t = matmul_bias(t, jnp.transpose(aw), out_dtype=jnp.float32)  # (S*N*C*Ho, Wo)
  return t.reshape(s, n, c, ho, wo)


# --------------------------------------------------------------------------
# ResNet-50 backbone (features_only, out_indices=(4,)) + attention model
# --------------------------------------------------------------------------
def bottleneck_fwd(x, blk, stride, groups):
  out = conv2d(x, blk['conv1'])
  out = batchnorm2d(out, blk['bn1_g'], blk['bn1_b'], relu=True, groups=groups)
  out = conv2d(out, blk['conv2'], stride=stride, pad=1)
  out = batchnorm2d(out, blk['bn2_g'], blk['bn2_b'], relu=True, groups=groups)
  out = conv2d(out, blk['conv3'])
  if 'down_conv' in blk:
    idt = conv2d(x, blk['down_conv'], stride=stride)
    idt = batchnorm2d(idt, blk['down_bn_g'], blk['down_bn_b'], relu=False,
                      groups=groups)
  else:
    idt = x
  # fused bn3 + residual add + ReLU (one HBM round-trip instead of three)
  return batchnorm2d(out, blk['bn3_g'], blk['bn3_b'], relu=True, residual=idt,
                     groups=groups)


def backbone_fwd(x, bp, groups):
  x = conv2d(x, bp['conv1'], stride=2, pad=3)
  x = batchnorm2d(x, bp['bn1_g'], bp['bn1_b'], relu=True, groups=groups)
  x = maxpool_3x3_s2_p1(x)
  for si, stage in enumerate(bp['stages']):
    for bi, blk in enumerate(stage):
      x = bottleneck_fwd(x, blk, STAGE_STRIDES[si] if bi == 0 else 1, groups)
  return x                                                  # (N, H/32, W/32, 2048)


def model_fwd(params, x_nchw):
  x = jnp.transpose(x_nchw, (0, 2, 3, 1)).astype(jnp.float32)   # NCHW -> NHWC
  n = x.shape[0]

  # Shared backbone: rgb + aux in ONE batched conv pass (weights shared, halves weight
  # DMAs); BatchNorm statistics are still computed PER STREAM via groups=2, matching
  # the sequential reference's training-mode numerics.
  both = jnp.concatenate([x[..., :3], x[..., 3:6]], axis=0)
  feats = backbone_fwd(both, params['backbone'], groups=2)
  rgb_f, aux_f = feats[:n], feats[n:]
  rgb_f = batchnorm2d(rgb_f, params['rgb_norm_g'], params['rgb_norm_b'])
  aux_f = batchnorm2d(aux_f, params['aux_norm_g'], params['aux_norm_b'])

  # MultiStreamAttention
  concat = jnp.concatenate([rgb_f, aux_f], axis=-1)             # 4096 channels
  att = conv2d(concat, params['att_conv1_w'], params['att_conv1_b'], pad=2)
  att = batchnorm2d(att, params['att_bn_g'], params['att_bn_b'], relu=True)
  att = conv2d(att, params['att_conv2_w'], params['att_conv2_b'])   # (N,Hf,Wf,2)
  merged_f, att_w = attention_merge(att, rgb_f, aux_f)

  # Three 1x1 heads batched into one matmul
  hf, wf = rgb_f.shape[1], rgb_f.shape[2]
  m = n * hf * wf
  ncls = params['conv1x1_w'].shape[0]
  xh = jnp.concatenate([merged_f.reshape(m, 2048),
                        rgb_f.reshape(m, 2048),
                        aux_f.reshape(m, 2048)], axis=0)
  wh = jnp.concatenate(
      [jnp.transpose(params['conv1x1_w'].reshape(ncls, 2048)),
       jnp.transpose(params['stream_w'][0].reshape(ncls, 2048)),
       jnp.transpose(params['stream_w'][1].reshape(ncls, 2048))], axis=1)
  bh = jnp.concatenate([params['conv1x1_b'],
                        params['stream_b'][0], params['stream_b'][1]])
  yh = matmul_bias(xh, wh, bh)                                  # (3m, 3*ncls) f32
  heads = jnp.stack([yh[0:m, 0:ncls],
                     yh[m:2 * m, ncls:2 * ncls],
                     yh[2 * m:3 * m, 2 * ncls:3 * ncls]], axis=0)
  heads = heads.reshape(3, n, hf, wf, ncls)

  up = upsample_x32_to_nchw(heads)                              # (3, N, ncls, H, W)
  final_nchw = up[0]
  return {
      'encoder_feature': None,
      'final_pred': final_nchw,
      'stream_pred': [up[1], up[2]],
      'attention_weights': jnp.transpose(att_w, (0, 3, 1, 2)),
      'logits': final_nchw,
  }


# --------------------------------------------------------------------------
# Deterministic synthetic parameter initialization
# --------------------------------------------------------------------------
class KeyGen:
  def __init__(self, seed):
    self._key = jax.random.PRNGKey(seed)

  def __call__(self):
    self._key, sub = jax.random.split(self._key)
    return sub


def conv_init(kg, cout, cin, kh, kw, scale=0.05):
  return scale * jax.random.normal(kg(), (cout, cin, kh, kw), jnp.float32)


def bn_init(c):
  return jnp.ones((c,), jnp.float32), jnp.zeros((c,), jnp.float32)


def init_backbone(kg):
  bp = {'conv1': conv_init(kg, 64, 3, 7, 7)}
  bp['bn1_g'], bp['bn1_b'] = bn_init(64)
  stages = []
  in_ch = 64
  for width, nblocks, stride in zip(STAGE_WIDTHS, STAGE_BLOCKS, STAGE_STRIDES):
    blocks = []
    for bi in range(nblocks):
      s = stride if bi == 0 else 1
      blk = {
          'conv1': conv_init(kg, width, in_ch, 1, 1),
          'conv2': conv_init(kg, width, width, 3, 3),
          'conv3': conv_init(kg, width * 4, width, 1, 1),
      }
      blk['bn1_g'], blk['bn1_b'] = bn_init(width)
      blk['bn2_g'], blk['bn2_b'] = bn_init(width)
      blk['bn3_g'], blk['bn3_b'] = bn_init(width * 4)
      if s != 1 or in_ch != width * 4:
        blk['down_conv'] = conv_init(kg, width * 4, in_ch, 1, 1)
        blk['down_bn_g'], blk['down_bn_b'] = bn_init(width * 4)
      blocks.append(blk)
      in_ch = width * 4
    stages.append(blocks)
  bp['stages'] = stages
  return bp


def init_params(seed, num_classes):
  kg = KeyGen(seed)
  p = {'backbone': init_backbone(kg)}
  p['rgb_norm_g'], p['rgb_norm_b'] = bn_init(2048)
  p['aux_norm_g'], p['aux_norm_b'] = bn_init(2048)
  p['att_conv1_w'] = conv_init(kg, 224, 4096, 5, 5, scale=0.01)
  p['att_conv1_b'] = 0.01 * jax.random.normal(kg(), (224,), jnp.float32)
  p['att_bn_g'], p['att_bn_b'] = bn_init(224)
  p['att_conv2_w'] = conv_init(kg, 2, 224, 1, 1)
  p['att_conv2_b'] = 0.01 * jax.random.normal(kg(), (2,), jnp.float32)
  p['conv1x1_w'] = conv_init(kg, num_classes, 2048, 1, 1)
  p['conv1x1_b'] = 0.01 * jax.random.normal(kg(), (num_classes,), jnp.float32)
  p['stream_w'] = [conv_init(kg, num_classes, 2048, 1, 1) for _ in range(2)]
  p['stream_b'] = [0.01 * jax.random.normal(kg(), (num_classes,), jnp.float32)
                   for _ in range(2)]
  return p


def _conv_self_check():
  """Validate the phase-decomposed stride-2 direct conv against XLA (bf16 tolerance)."""
  xt = jax.random.normal(jax.random.PRNGKey(1), (1, 9, 9, 3), jnp.float32)
  wt = 0.05 * jax.random.normal(jax.random.PRNGKey(2), (8, 3, 3, 3), jnp.float32)
  ours = conv2d(xt, wt, stride=2, pad=1, out_dtype=jnp.float32)
  ref = lax.conv_general_dilated(
      xt, jnp.transpose(wt, (2, 3, 1, 0)), window_strides=(2, 2),
      padding=((1, 1), (1, 1)), dimension_numbers=('NHWC', 'HWIO', 'NHWC'))
  err = float(jnp.max(jnp.abs(ours.astype(jnp.float32) - ref)))
  assert err < 5e-2, f"direct-conv self-check failed, max abs err {err}"


# --------------------------------------------------------------------------
if __name__ == "__main__":
  num_classes = 3
  batch, in_channels, height, width = 2, 6, 64, 64   # rgb (3) + aux (3)

  _conv_self_check()

  params = init_params(0, num_classes)
  x = jax.random.normal(jax.random.PRNGKey(0),
                        (batch, in_channels, height, width), jnp.float32)

  fwd = jax.jit(model_fwd)
  out = fwd(params, x)
  out = jax.block_until_ready(out)

  assert out['final_pred'].shape == (batch, num_classes, height, width)
  assert out['logits'].shape == (batch, num_classes, height, width)
  assert len(out['stream_pred']) == 2
  assert out['stream_pred'][0].shape == (batch, num_classes, height, width)
  assert out['attention_weights'].shape == (batch, 2, height // 32, width // 32)
  assert bool(jnp.all(jnp.isfinite(out['final_pred'])))
  assert bool(jnp.all(jnp.isfinite(out['attention_weights'])))

  print("KERNEL_OK")
</pallas_src>

<mosaic_0001>
module attributes {stable_mosaic.version = 11 : i64} {
  func.func @_conv_kernel(%arg0: i32, %arg1: i32, %arg2: i32, %arg3: memref<1x6x9x12xbf16, #tpu.memory_space<vmem>>, %arg4: memref<4x12x128xbf16, #tpu.memory_space<vmem>>, %arg5: memref<1x128xf32, #tpu.memory_space<vmem>>, %arg6: memref<1x40x128xf32, #tpu.memory_space<vmem>>, %arg7: memref<40x128xf32, #tpu.memory_space<vmem>>) attributes {dimension_semantics = [#tpu.dimension_semantics<parallel>, #tpu.dimension_semantics<parallel>, #tpu.dimension_semantics<arbitrary>], iteration_bounds = array<i64: 1, 1, 1>, scalar_prefetch = 0 : i64, scratch_operands = 1 : i64, tpu.core_type = #tpu.core_type<tc>, window_params = [{transform_indices = @transform_0, window_bounds = array<i64: 1, 6, 9, 12>}, {transform_indices = @transform_1, window_bounds = array<i64: 4, 12, 128>}, {transform_indices = @transform_2, window_bounds = array<i64: 1, 128>}, {transform_indices = @transform_3, window_bounds = array<i64: 1, 40, 128>}]} {
    %c0 = arith.constant 0 : index
    %c0_0 = arith.constant 0 : index
    %c0_1 = arith.constant 0 : index
    %c0_2 = arith.constant 0 : index
    %0 = vector.load %arg3[%c0, %c0_0, %c0_1, %c0_2] : memref<1x6x9x12xbf16, #tpu.memory_space<vmem>>, vector<1x5x8x12xbf16>
    %1 = vector.shape_cast %0 : vector<1x5x8x12xbf16> to vector<5x8x12xbf16>
    %2 = vector.shape_cast %1 : vector<5x8x12xbf16> to vector<40x12xbf16>
    %c0_3 = arith.constant 0 : index
    %c0_4 = arith.constant 0 : index
    %c0_5 = arith.constant 0 : index
    %3 = vector.load %arg4[%c0_3, %c0_4, %c0_5] : memref<4x12x128xbf16, #tpu.memory_space<vmem>>, vector<1x12x128xbf16>
    %4 = vector.shape_cast %3 : vector<1x12x128xbf16> to vector<12x128xbf16>
    %cst = arith.constant dense<0.000000e+00> : vector<40x128xf32>
    %5 = tpu.matmul %2, %4, %cst {dimension_numbers = #tpu.dot_dimension_numbers<[1], [0], [0], [1], [0, 0, 1, 1], [], []>} : vector<40x12xbf16>, vector<12x128xbf16>, vector<40x128xf32> -> vector<40x128xf32>
    %c0_6 = arith.constant 0 : index
    %c0_7 = arith.constant 0 : index
    %c1 = arith.constant 1 : index
    %c0_8 = arith.constant 0 : index
    %6 = vector.load %arg3[%c0_6, %c0_7, %c1, %c0_8] : memref<1x6x9x12xbf16, #tpu.memory_space<vmem>>, vector<1x5x8x12xbf16>
    %7 = vector.shape_cast %6 : vector<1x5x8x12xbf16> to vector<5x8x12xbf16>
    %8 = vector.shape_cast %7 : vector<5x8x12xbf16> to vector<40x12xbf16>
    %c1_9 = arith.constant 1 : index
    %c0_10 = arith.constant 0 : index
    %c0_11 = arith.constant 0 : index
    %9 = vector.load %arg4[%c1_9, %c0_10, %c0_11] : memref<4x12x128xbf16, #tpu.memory_space<vmem>>, vector<1x12x128xbf16>
    %10 = vector.shape_cast %9 : vector<1x12x128xbf16> to vector<12x128xbf16>
    %cst_12 = arith.constant dense<0.000000e+00> : vector<40x128xf32>
    %11 = tpu.matmul %8, %10, %cst_12 {dimension_numbers = #tpu.dot_dimension_numbers<[1], [0], [0], [1], [0, 0, 1, 1], [], []>} : vector<40x12xbf16>, vector<12x128xbf16>, vector<40x128xf32> -> vector<40x128xf32>
    %12 = arith.addf %5, %11 : vector<40x128xf32>
    %c0_13 = arith.constant 0 : index
    %c1_14 = arith.constant 1 : index
    %c0_15 = arith.constant 0 : index
    %c0_16 = arith.constant 0 : index
    %13 = vector.load %arg3[%c0_13, %c1_14, %c0_15, %c0_16] : memref<1x6x9x12xbf16, #tpu.memory_space<vmem>>, vector<1x5x8x12xbf16>
    %14 = vector.shape_cast %13 : vector<1x5x8x12xbf16> to vector<5x8x12xbf16>
    %15 = vector.shape_cast %14 : vector<5x8x12xbf16> to vector<40x12xbf16>
    %c2 = arith.constant 2 : index
    %c0_17 = arith.constant 0 : index
    %c0_18 = arith.constant 0 : index
    %16 = vector.load %arg4[%c2, %c0_17, %c0_18] : memref<4x12x128xbf16, #tpu.memory_space<vmem>>, vector<1x12x128xbf16>
    %17 = vector.shape_cast %16 : vector<1x12x128xbf16> to vector<12x128xbf16>
    %cst_19 = arith.constant dense<0.000000e+00> : vector<40x128xf32>
    %18 = tpu.matmul %15, %17, %cst_19 {dimension_numbers = #tpu.dot_dimension_numbers<[1], [0], [0], [1], [0, 0, 1, 1], [], []>} : vector<40x12xbf16>, vector<12x128xbf16>, vector<40x128xf32> -> vector<40x128xf32>
    %19 = arith.addf %12, %18 : vector<40x128xf32>
    %c0_20 = arith.constant 0 : index
    %c1_21 = arith.constant 1 : index
    %c1_22 = arith.constant 1 : index
    %c0_23 = arith.constant 0 : index
    %20 = vector.load %arg3[%c0_20, %c1_21, %c1_22, %c0_23] : memref<1x6x9x12xbf16, #tpu.memory_space<vmem>>, vector<1x5x8x12xbf16>
    %21 = vector.shape_cast %20 : vector<1x5x8x12xbf16> to vector<5x8x12xbf16>
    %22 = vector.shape_cast %21 : vector<5x8x12xbf16> to vector<40x12xbf16>
    %c3 = arith.constant 3 : index
    %c0_24 = arith.constant 0 : index
    %c0_25 = arith.constant 0 : index
    %23 = vector.load %arg4[%c3, %c0_24, %c0_25] : memref<4x12x128xbf16, #tpu.memory_space<vmem>>, vector<1x12x128xbf16>
    %24 = vector.shape_cast %23 : vector<1x12x128xbf16> to vector<12x128xbf16>
    %cst_26 = arith.constant dense<0.000000e+00> : vector<40x128xf32>
    %25 = tpu.matmul %22, %24, %cst_26 {dimension_numbers = #tpu.dot_dimension_numbers<[1], [0], [0], [1], [0, 0, 1, 1], [], []>} : vector<40x12xbf16>, vector<12x128xbf16>, vector<40x128xf32> -> vector<40x128xf32>
    %26 = arith.addf %19, %25 : vector<40x128xf32>
    %c0_i32 = arith.constant 0 : i32
    %27 = arith.cmpi eq, %arg2, %c0_i32 : i32
    %28 = arith.extui %27 : i1 to i32
    %c0_i32_27 = arith.constant 0 : i32
    %29 = arith.cmpi ne, %28, %c0_i32_27 : i32
    scf.if %29 {
      %c0_32 = arith.constant 0 : index
      %c0_33 = arith.constant 0 : index
      %36 = vector.load %arg5[%c0_32, %c0_33] : memref<1x128xf32, #tpu.memory_space<vmem>>, vector<1x128xf32>
      %37 = vector.broadcast %36 : vector<1x128xf32> to vector<40x128xf32>
      %38 = arith.addf %26, %37 : vector<40x128xf32>
      %c0_34 = arith.constant 0 : index
      %c0_35 = arith.constant 0 : index
      %39 = vector.load %arg7[%c0_34, %c0_35] : memref<40x128xf32, #tpu.memory_space<vmem>>, vector<40x128xf32>
      tpu.vector_store %arg7[%c0_34, %c0_35], %38 {strides = array<i32>} : memref<40x128xf32, #tpu.memory_space<vmem>>, vector<40x128xf32>,
    } else {
    }
    %c0_i32_28 = arith.constant 0 : i32
    %30 = arith.cmpi sgt, %arg2, %c0_i32_28 : i32
    %31 = arith.extui %30 : i1 to i32
    %c0_i32_29 = arith.constant 0 : i32
    %32 = arith.cmpi ne, %31, %c0_i32_29 : i32
    scf.if %32 {
      %c0_32 = arith.constant 0 : index
      %c0_33 = arith.constant 0 : index
      %36 = vector.load %arg7[%c0_32, %c0_33] : memref<40x128xf32, #tpu.memory_space<vmem>>, vector<40x128xf32>
      %37 = arith.addf %36, %26 : vector<40x128xf32>
      %c0_34 = arith.constant 0 : index
      %c0_35 = arith.constant 0 : index
      %38 = vector.load %arg7[%c0_34, %c0_35] : memref<40x128xf32, #tpu.memory_space<vmem>>, vector<40x128xf32>
      tpu.vector_store %arg7[%c0_34, %c0_35], %37 {strides = array<i32>} : memref<40x128xf32, #tpu.memory_space<vmem>>, vector<40x128xf32>,
    } else {
    }
    %c0_i32_30 = arith.constant 0 : i32
    %33 = arith.cmpi eq, %arg2, %c0_i32_30 : i32
    %34 = arith.extui %33 : i1 to i32
    %c0_i32_31 = arith.constant 0 : i32
    %35 = arith.cmpi ne, %34, %c0_i32_31 : i32
    scf.if %35 {
      %c0_32 = arith.constant 0 : index
      %c0_33 = arith.constant 0 : index
      %36 = vector.load %arg7[%c0_32, %c0_33] : memref<40x128xf32, #tpu.memory_space<vmem>>, vector<40x128xf32>
      %c0_34 = arith.constant 0 : index
      %c0_35 = arith.constant 0 : index
      %c0_36 = arith.constant 0 : index
      %37 = vector.load %arg6[%c0_34, %c0_35, %c0_36] : memref<1x40x128xf32, #tpu.memory_space<vmem>>, vector<1x40x128xf32>
      %38 = vector.shape_cast %37 : vector<1x40x128xf32> to vector<40x128xf32>
      %39 = vector.shape_cast %36 : vector<40x128xf32> to vector<1x40x128xf32>
      tpu.vector_store %arg6[%c0_34, %c0_35, %c0_36], %39 {strides = array<i32>} : memref<1x40x128xf32, #tpu.memory_space<vmem>>, vector<1x40x128xf32>,
    } else {
    }
    return
  }
  func.func @transform_0(%arg0: i32, %arg1: i32, %arg2: i32) -> (i32, i32, i32, i32) {
    %c0_i32 = arith.constant 0 : i32
    %c0_i32_0 = arith.constant 0 : i32
    %c0_i32_1 = arith.constant 0 : i32
    return %arg0, %c0_i32, %c0_i32_0, %arg2 : i32, i32, i32, i32
  }
  func.func @transform_1(%arg0: i32, %arg1: i32, %arg2: i32) -> (i32, i32, i32) {
    %c0_i32 = arith.constant 0 : i32
    %c0_i32_0 = arith.constant 0 : i32
    return %c0_i32, %arg2, %arg1 : i32, i32, i32
  }
  func.func @transform_2(%arg0: i32, %arg1: i32, %arg2: i32) -> (i32, i32) {
    %c0_i32 = arith.constant 0 : i32
    %c0_i32_0 = arith.constant 0 : i32
    return %c0_i32, %arg1 : i32, i32
  }
  func.func @transform_3(%arg0: i32, %arg1: i32, %arg2: i32) -> (i32, i32, i32) {
    %c0_i32 = arith.constant 0 : i32
    %c0_i32_0 = arith.constant 0 : i32
    return %arg0, %c0_i32, %arg1 : i32, i32, i32
  }
}

</mosaic_0001>

<bundles_post_ra>
// kernel: tpu_custom_call.1
= control target key start
LH: loop header
LB: loop body
LE: loop exit
PB: predicated region body
PF: predicated region fallthrough
CT: control target
= control target key end

     0   :  { %vm127_vm0 = vcmask 1045504   ;;  %v772_v0 = vmov 0.0   ;;  %vm773_vm1 = vmmov 0   ;;  %vm117_vm2 = vcmask 97280   ;;  %s967_s0 = inlined_call_operand.vmem [shape: bf16[1,6,9,12], index: 0, kind: input, shape index: {}]   ;;  %s968_s1 = inlined_call_operand.vmem [shape: bf16[4,12,128], index: 1, kind: input, shape index: {}]   ;;  %s969_s2 = inlined_call_operand.vmem [shape: f32[1,128], index: 2, kind: input, shape index: {}]   ;;  %s970_s3 = inlined_call_operand.hbm [shape: f32[1,40,128], index: 3, kind: output, shape index: {}]  }
   0x1   :  { %677 = vmatprep.subr.bf16.mxu0 %v772_v0  ;;  %691 = vmatprep.subr.bf16.mxu1 %v772_v0  ;;  %v738_v1 = vld [vmem:[%s968_s1 + $0x8] sm:$0x3f]   ;;  %v739_v2 = vld [vmem:[%s968_s1] sm:$0x3f]   ;;  %vm28_vm3 = vsmask.f32 3328 }
   0x2   :  { %v16_v3 = vld [vmem:[%s967_s0] sm:$0xf]  ;;  %v129_v4 = vsel %vm127_vm0, %v738_v1, 0  ;;  %693 = vmatprep.mubr.msk.bf16.mxu1 %vm773_vm1, %v772_v0  ;;  %679 = vmatprep.mubr.msk.bf16.mxu0 %vm773_vm1, %v772_v0  ;;  %v17_v5 = vld [vmem:[%s967_s0 + $0x8] sm:$0xf]  ;;  %v215_v8 = vsel %vm127_vm0, %v739_v2, 0 }
   0x3   :  { %v32_v6 = vshrl.u32 %v16_v3, 16  ;;  %v35_v7 = vshll.u32 %v16_v3, 16  ;;  %678 = vmatpush3.bf16.msra.mxu0 %v129_v4  ;;  %v46_v9 = vshrl.u32 %v17_v5, 16  ;;  %v49_v10 = vshll.u32 %v17_v5, 16  ;;  %v23_v12 = vld [vmem:[%s967_s0 + $0x4] sm:$0x1]  ;;  %692 = vmatpush3.bf16.msra.mxu1 %v215_v8 }
   0x4   :  { %v620_v11 = vcombine.low %v16_v3, %v17_v5  ;;  %705 = vmatprep.subr.bf16.mxu0 %v772_v0  ;;  %v24_v15 = vld [vmem:[%s967_s0 + $0xc] sm:$0x1]  ;;  %vm29_vm4 = vsmask.f32 7440  ;;  %v41_v18 = vshll.u32 %v23_v12, 16  ;;  %719 = vmatprep.subr.bf16.mxu1 %v772_v0 }
   0x5   :  { %v34_v13 = vrot.slane %v32_v6, 4  ;;  %v37_v14 = vrot.slane %v35_v7, 5  ;;  %v48_v16 = vrot.slane %v46_v9, 4  ;;  %v51_v17 = vrot.slane %v49_v10, 5  ;;  %vm826_vm5 = vmor %vm28_vm3, %vm29_vm4  ;;  %v741_v24 = vld [vmem:[%s968_s1 + $0x10] sm:$0x3f]  }
   0x6   :  { %v55_v20 = vshll.u32 %v24_v15, 16  ;;  %694 = vmatmul.mubr.msk.bf16.vlgmr.msra.gmra.mrb[0].mxu1 %vm117_vm2, %v620_v11  ;;  %v43_v22 = vrot.slane %v41_v18, 5  ;;  %v742_v27 = vld [vmem:[%s968_s1 + $0x18] sm:$0x3f]   ;;  %v310_v29 = vsel %vm127_vm0, %v741_v24, 0 }
   0x7   :  { %v38_v19 = vor.u32 %v37_v14, %v34_v13  ;;  %v52_v23 = vor.u32 %v51_v17, %v48_v16  ;;  %697 = vmatprep.mubr.msk.bf16.mxu1 %vm773_vm1, %v772_v0  ;;  %v18_v30 = vld [vmem:[%s967_s0 + $0x10] sm:$0xf]  ;;  %v19_v31 = vld [vmem:[%s967_s0 + $0x18] sm:$0xf]  ;;  %v479_v33 = vsel %vm127_vm0, %v742_v27, 0 }
   0x8   :  { %v57_v26 = vrot.slane %v55_v20, 5  ;;  %v60_v34 = vshrl.u32 %v18_v30, 16  ;;  %v63_v35 = vshll.u32 %v18_v30, 16  ;;  %v25_v36 = vld [vmem:[%s967_s0 + $0x14] sm:$0x1]  ;;  %720 = vmatpush3.bf16.msra.mxu1 %v479_v33  ;;  %v74_v38 = vshrl.u32 %v19_v31, 16 }
   0x9   :  { %v39_v25 = vrot.slane %v38_v19, 4  ;;  %v53_v28 = vrot.slane %v52_v23, 4  ;;  %v77_v39 = vshll.u32 %v19_v31, 16  ;;  %v621_v40 = vcombine.low %v18_v30, %v19_v31  ;;  %v26_v41 = vld [vmem:[%s967_s0 + $0x1c] sm:$0x1] }
   0xa   :  { %v859_v42 = vld [vmem:[%s967_s0 + $0x20] sm:$0xf]  ;;  %v62_v44 = vrot.slane %v60_v34, 4  ;;  %v65_v45 = vrot.slane %v63_v35, 5  ;;  %v69_v46 = vshll.u32 %v25_v36, 16  ;;  %v76_v48 = vrot.slane %v74_v38, 4 }
   0xb   :  { %v44_v32 = vsel %vm826_vm5, %v39_v25, %v43_v22  ;;  %v58_v37 = vsel %vm826_vm5, %v53_v28, %v57_v26  ;;  %v27_v47 = vld [vmem:[%s967_s0 + $0x24] sm:$0x1]  ;;  %v79_v49 = vrot.slane %v77_v39, 5  ;;  %v83_v50 = vshll.u32 %v26_v41, 16  ;;  %v641_v52 = vld [vmem:[%s967_s0 + $0x8] sm:$0xf] }
   0xc   :  { %v613_v43 = vcombine.low %v44_v32, %v58_v37  ;;  %v88_v51 = vshrl.u32 %v859_v42, 16  ;;  %v66_v53 = vor.u32 %v65_v45, %v62_v44  ;;  %v71_v54 = vrot.slane %v69_v46, 5  ;;  %v642_v57 = vld [vmem:[%s967_s0 + $0xc] sm:$0x1]  ;;  %v643_v58 = vld [vmem:[%s967_s0 + $0x10] sm:$0xf] }
   0xd   :  { %v91_v55 = vshll.u32 %v859_v42, 16  ;;  %v622_v56 = vcombine.low %v859_v42, %v859_v42  ;;  %v80_v59 = vor.u32 %v79_v49, %v76_v48  ;;  %v85_v60 = vrot.slane %v83_v50, 5  ;;  %v644_v63 = vld [vmem:[%s967_s0 + $0x14] sm:$0x1]  ;;  %v645_v13 = vld [vmem:[%s967_s0 + $0x18] sm:$0xf] }
   0xe   :  { %680 = vmatmul.mubr.msk.bf16.vlgmr.msra.gmra.mrb[0].mxu0 %vm117_vm2, %v613_v43  ;;  %v90_v61 = vrot.slane %v88_v51, 4  ;;  %v97_v62 = vshll.u32 %v27_v47, 16  ;;  %698 = vmatmul.mubr.msk.bf16.gmra.mrb[4].mxu1 %vm117_vm2, %v621_v40  ;;  %v67_v1 = vrot.slane %v66_v53, 4  ;;  %v384_v3 = vshrl.u32 %v641_v52, 16  ;;  %v646_v23 = vld [vmem:[%s967_s0 + $0x1c] sm:$0x1] }
   0xf   :  { %706 = vmatpush3.bf16.msra.mxu0 %v310_v29  ;;  %683 = vmatprep.mubr.msk.bf16.mxu0 %vm773_vm1, %v772_v0  ;;  %v93_v2 = vrot.slane %v91_v55, 5  ;;  %v387_v4 = vshll.u32 %v641_v52, 16  ;;  %v81_v5 = vrot.slane %v80_v59, 4  ;;  %v393_v7 = vshll.u32 %v642_v57, 16  ;;  %v647_v24 = vld [vmem:[%s967_s0 + $0x20] sm:$0xf] }
  0x10   :  { %701 = vmatprep.mubr.msk.bf16.mxu1 %vm773_vm1, %v772_v0  ;;  %v99_v6 = vrot.slane %v97_v62, 5  ;;  %v398_v8 = vshrl.u32 %v643_v58, 16  ;;  %v72_v9 = vsel %vm826_vm5, %v67_v1, %v71_v54  ;;  %v386_v11 = vrot.slane %v384_v3, 4  ;;  %v648_v30 = vld [vmem:[%s967_s0 + $0x24] sm:$0x1] }
  0x11   :  { %v94_v10 = vor.u32 %v93_v2, %v90_v61  ;;  %v389_v12 = vrot.slane %v387_v4, 5  ;;  %v86_v14 = vsel %vm826_vm5, %v81_v5, %v85_v60  ;;  %v395_v15 = vrot.slane %v393_v7, 5  ;;  %v649_v36 = vld [vmem:[%s967_s0 + $0x28] sm:$0xf] }
  0x12   :  { %v400_v16 = vrot.slane %v398_v8, 4  ;;  %v401_v17 = vshll.u32 %v643_v58, 16  ;;  %v614_v18 = vcombine.low %v72_v9, %v86_v14  ;;  %v407_v22 = vshll.u32 %v644_v63, 16 }
  0x13   :  { %v95_v19 = vrot.slane %v94_v10, 4  ;;  %v390_v20 = vor.u32 %v389_v12, %v386_v11  ;;  %v412_v26 = vshrl.u32 %v645_v13, 16  ;;  %v415_v27 = vshll.u32 %v645_v13, 16 }
  0x14   :  { %v403_v25 = vrot.slane %v401_v17, 5  ;;  %v426_v31 = vshrl.u32 %v647_v24, 16  ;;  %v409_v33 = vrot.slane %v407_v22, 5  ;;  %v421_v38 = vshll.u32 %v646_v23, 16 }
  0x15   :  { %v100_v28 = vsel %vm826_vm5, %v95_v19, %v99_v6  ;;  %v391_v29 = vrot.slane %v390_v20, 4  ;;  %v414_v34 = vrot.slane %v412_v26, 4  ;;  %v417_v35 = vrot.slane %v415_v27, 5 }
  0x16   :  { %684 = vmatmul.mubr.msk.bf16.gmra.mrb[4].mxu0 %vm117_vm2, %v614_v18  ;;  %v404_v32 = vor.u32 %v403_v25, %v400_v16  ;;  %702 = vmatmul.mubr.msk.bf16.gmra.mrb[8].mxu1 %vm117_vm2, %v622_v56  ;;  %v428_v39 = vrot.slane %v426_v31, 4  ;;  %v429_v40 = vshll.u32 %v647_v24, 16  ;;  %v435_v43 = vshll.u32 %v648_v30, 16 }
  0x17   :  { %687 = vmatprep.mubr.msk.bf16.mxu0 %vm773_vm1, %v772_v0  ;;  %v396_v37 = vsel %vm826_vm5, %v391_v29, %v395_v15  ;;  %721 = vmatprep.mubr.msk.bf16.mxu1 %vm773_vm1, %v772_v0  ;;  %v418_v42 = vor.u32 %v417_v35, %v414_v34  ;;  %v440_v44 = vshrl.u32 %v649_v36, 16  ;;  %v615_v45 = vcombine.low %v100_v28, %v100_v28 }
  0x18   :  { %v405_v41 = vrot.slane %v404_v32, 4  ;;  %v431_v46 = vrot.slane %v429_v40, 5  ;;  %v443_v47 = vshll.u32 %v649_v36, 16 }
  0x1a   :  { %v410_v48 = vsel %vm826_vm5, %v405_v41, %v409_v33 }
  0x1b   :  { %8 = vsyncpa [#allocation4], 0  ;;  %v653_v49 = vcombine.low %v396_v37, %v410_v48  ;;  %v423_v50 = vrot.slane %v421_v38, 5  ;;  %v432_v51 = vor.u32 %v431_v46, %v428_v39  ;;  %v419_v52 = vrot.slane %v418_v42, 4  ;;  %v650_v57 = vld [vmem:[%s967_s0 + $0x2c] sm:$0x1] }
  0x1c   :  { %v437_v53 = vrot.slane %v435_v43, 5  ;;  %v442_v54 = vrot.slane %v440_v44, 4  ;;  %v445_v55 = vrot.slane %v443_v47, 5  ;;  %v449_v61 = vshll.u32 %v650_v57, 16  ;;  %v745_v62 = vld [vmem:[%s967_s0 + $0x8] ss:$8 sps:$4 sm:$0xff]  }
  0x1d   :  { %v433_v56 = vrot.slane %v432_v51, 4  ;;  %v424_v58 = vsel %vm826_vm5, %v419_v52, %v423_v50  ;;  %v746_v4 = vld [vmem:[%s967_s0 + $0x18] ss:$8 sps:$4 sm:$0xff]   ;;  %v747_v6 = vld [vmem:[%s967_s0 + $0x28] ss:$0 sps:$4 sm:$0xff]  }
  0x1e   :  { %688 = vmatmul.mubr.msk.bf16.gmra.mrb[8].mxu0 %vm117_vm2, %v615_v45  ;;  %722 = vmatmul.mubr.msk.bf16.vlgmr.msra.gmra.mrb[12].mxu1 %vm117_vm2, %v653_v49  ;;  %v446_v60 = vor.u32 %v445_v55, %v442_v54  ;;  %v451_v2 = vrot.slane %v449_v61, 5  ;;  %v660_v42 = vld [vmem:[%s969_s2] ss:$0 sm:$0xff]  ;;  %s774_s2 = smov [#allocation3]  }
  0x1f   :  { %707 = vmatprep.mubr.msk.bf16.mxu0 %vm773_vm1, %v772_v0  ;;  %725 = vmatprep.mubr.msk.bf16.mxu1 %vm773_vm1, %v772_v0  ;;  %v438_v59 = vsel %vm826_vm5, %v433_v56, %v437_v53  ;;  %s600_s11 = sshll.u32 %s774_s2, 4  ;;  %s601_s11 = int_to_ptr.vmem [resolvable:$true] %s600_s11 }
  0x20   :  { %v654_v63 = vcombine.low %v424_v58, %v438_v59  ;;  %v447_v1 = vrot.slane %v446_v60, 4  ;;  %s748_s12 = scalar_lea.vmem %s601_s11, 640  ;;  %p753_p1 = scmp.lt.s32.totalorder %s601_s11, %s601_s11 }
  0x21   :  { %p749_p0 = scmp.ne.s32.totalorder %s601_s11, %s748_s12  ;;  %p754_p2 = scmp.lt.s32.totalorder %s748_s12, %s748_s12 }
  0x22   :  { %v452_v3 = vsel %vm826_vm5, %v447_v1, %v451_v2 }
  0x23   :  { %v655_v5 = vcombine.low %v452_v3, %v452_v3  ;;  %p755_p3 = por %p754_p2, %p753_p1 }
  0x25   :  { %p756_p4 = pnand %p755_p3, %p749_p0 }
  0x26   :  { %708 = vmatmul.mubr.msk.bf16.vlgmr.msra.gmra.mrb[12].mxu0 %vm117_vm2, %v745_v62  ;;  %726 = vmatmul.mubr.msk.bf16.gmra.mrb[16].mxu1 %vm117_vm2, %v654_v63 }
  0x27   :  { %711 = vmatprep.mubr.msk.bf16.mxu0 %vm773_vm1, %v772_v0  ;;  %729 = vmatprep.mubr.msk.bf16.mxu1 %vm773_vm1, %v772_v0 }
  0x2e   :  { %712 = vmatmul.mubr.msk.bf16.gmra.mrb[16].mxu0 %vm117_vm2, %v746_v4  ;;  %730 = vmatmul.mubr.msk.bf16.gmra.mrb[20].mxu1 %vm117_vm2, %v655_v5 }
  0x2f   :  { %715 = vmatprep.mubr.msk.bf16.mxu0 %vm773_vm1, %v772_v0 }
  0x36   :  { %716 = vmatmul.mubr.msk.bf16.gmra.mrb[20].mxu0 %vm117_vm2, %v747_v6 }
  0xd9   :  { %v251_v21 = vpop.f32.mrb[0].mxu1 }
  0xda   :  { %v695_v7 = vpop.f32.mrb[1].mxu1 }
  0xdb   :  { %v254_v8 = vpop.f32.mrb[2].mxu1 }
  0xdc   :  { %v696_v9 = vpop.f32.mrb[3].mxu1 }
  0xe1   :  { %v165_v10 = vpop.f32.mrb[0].mxu0  ;;  %v259_v14 = vpop.f32.mrb[4].mxu1 }
  0xe2   :  { %v252_v11 = vadd.f32 %v251_v21, %v165_v10  ;;  %v681_v12 = vpop.f32.mrb[1].mxu0  ;;  %v699_v0 = vpop.f32.mrb[5].mxu1 }
  0xe3   :  { %v168_v13 = vpop.f32.mrb[2].mxu0  ;;  %v262_v17 = vpop.f32.mrb[6].mxu1 }
  0xe4   :  { %v255_v15 = vadd.f32 %v254_v8, %v168_v13  ;;  %v682_v16 = vpop.f32.mrb[3].mxu0  ;;  %v700_v18 = vpop.f32.mrb[7].mxu1 }
  0xe9   :  { %v173_v19 = vpop.f32.mrb[4].mxu0  ;;  %v267_v24 = vpop.f32.mrb[8].mxu1 }
  0xea   :  { %v260_v20 = vadd.f32 %v259_v14, %v173_v19  ;;  %v685_v22 = vpop.f32.mrb[5].mxu0  ;;  %v703_v27 = vpop.f32.mrb[9].mxu1 }
  0xeb   :  { %v176_v23 = vpop.f32.mrb[6].mxu0  ;;  %v270_v28 = vpop.f32.mrb[10].mxu1 }
  0xec   :  { %v263_v25 = vadd.f32 %v262_v17, %v176_v23  ;;  %v686_v26 = vpop.f32.mrb[7].mxu0  ;;  %v704_v29 = vpop.f32.mrb[11].mxu1 }
  0xf1   :  { %v181_v30 = vpop.f32.mrb[8].mxu0  ;;  %v515_v34 = vpop.f32.mrb[12].mxu1 }
  0xf2   :  { %v268_v31 = vadd.f32 %v267_v24, %v181_v30  ;;  %v689_v32 = vpop.f32.mrb[9].mxu0  ;;  %v723_v36 = vpop.f32.mrb[13].mxu1 }
  0xf3   :  { %v184_v33 = vpop.f32.mrb[10].mxu0  ;;  %v518_v37 = vpop.f32.mrb[14].mxu1 }
  0xf4   :  { %v690_v35 = vpop.f32.mrb[11].mxu0  ;;  %v724_v38 = vpop.f32.mrb[15].mxu1 }
  0xf9   :  { %v346_v39 = vpop.f32.mrb[12].mxu0  ;;  %v523_v44 = vpop.f32.mrb[16].mxu1 }
  0xfa   :  { %v368_v40 = vadd.f32 %v346_v39, %v252_v11  ;;  %v709_v41 = vpop.f32.mrb[13].mxu0  ;;  %v727_v48 = vpop.f32.mrb[17].mxu1 }
  0xfb   :  { %v349_v43 = vpop.f32.mrb[14].mxu0  ;;  %v526_v49 = vpop.f32.mrb[18].mxu1 }
  0xfc   :  { %v537_v45 = vadd.f32 %v515_v34, %v368_v40  ;;  %v369_v46 = vadd.f32 %v349_v43, %v255_v15  ;;  %v710_v47 = vpop.f32.mrb[15].mxu0  ;;  %v728_v52 = vpop.f32.mrb[19].mxu1 }
  0xfe   :  { %v553_v50 = vadd.f32 %v660_v42, %v537_v45  ;;  %v538_v51 = vadd.f32 %v518_v37, %v369_v46 }
 0x100   :  { %590 = vst [vmem:[#allocation3] sm:$0xff] %v553_v50  ;;  %v554_v53 = vadd.f32 %v660_v42, %v538_v51 }
 0x101   :  { %v354_v54 = vpop.f32.mrb[16].mxu0  ;;  %v531_v58 = vpop.f32.mrb[20].mxu1 }
 0x102   :  { %591 = vst [vmem:[#allocation3 + $0x8] sm:$0xff] %v554_v53  ;;  %v370_v55 = vadd.f32 %v354_v54, %v260_v20  ;;  %v713_v56 = vpop.f32.mrb[17].mxu0  ;;  %v731_v62 = vpop.f32.mrb[21].mxu1 }
 0x103   :  { %v357_v57 = vpop.f32.mrb[18].mxu0  ;;  %v534_v63 = vpop.f32.mrb[22].mxu1 }
 0x104   :  { %v539_v59 = vadd.f32 %v523_v44, %v370_v55  ;;  %v371_v60 = vadd.f32 %v357_v57, %v263_v25  ;;  %v714_v61 = vpop.f32.mrb[19].mxu0  ;;  %v732_v3 = vpop.f32.mrb[23].mxu1 }
 0x106   :  { %v555_v1 = vadd.f32 %v660_v42, %v539_v59  ;;  %v540_v2 = vadd.f32 %v526_v49, %v371_v60 }
 0x108   :  { %592 = vst [vmem:[#allocation3 + $0x10] sm:$0xff] %v555_v1  ;;  %v556_v4 = vadd.f32 %v660_v42, %v540_v2 }
 0x109   :  { %v362_v5 = vpop.f32.mrb[20].mxu0 }
 0x10a   :  { %593 = vst [vmem:[#allocation3 + $0x18] sm:$0xff] %v556_v4  ;;  %v372_v6 = vadd.f32 %v362_v5, %v268_v31  ;;  %v717_v21 = vpop.f32.mrb[21].mxu0 }
 0x10b   :  { %v365_v7 = vpop.f32.mrb[22].mxu0 }
 0x10c   :  { %v541_v8 = vadd.f32 %v531_v58, %v372_v6  ;;  %v718_v9 = vpop.f32.mrb[23].mxu0 }
 0x10e   :  { %v557_v10 = vadd.f32 %v660_v42, %v541_v8 }
 0x110   :  { %594 = vst [vmem:[#allocation3 + $0x20] sm:$0xff] %v557_v10 }
 0x111   :  { %759 = shalt.err (!%p756_p4)
}
 0x112   :  { %s760_s15 = scalar_lea.hbm %s970_s3, 640 }
 0x113   :  { %p761_p5 = scmp.ne.s32.totalorder %s970_s3, %s760_s15  ;;  %p764_p6 = scmp.lt.u32.totalorder %s760_s15, %s970_s3 }
 0x115   :  { %p766_p7 = pnand %p764_p6, %p761_p5 }
 0x117   :  { %769 = shalt.err (!%p766_p7)
}
 0x118   :  { %s775_s20 = smov 128   ;;  %s776_s21 = smov 8  }
 0x119   :  { %606 = dma.vmem_to_hbm [thread:$0]  %s601_s11, 640, %s970_s3, [#allocation4], %s775_s20, %s775_s20, %s776_s21  }
 0x11a   :  { %770 = dma.done.wait [#allocation4], 640  }
 0x11b   :  { %771 = vsyncadd [#allocation4], 4294966656 }
 0x11c   :  { %610 = vsyncpa [#allocation4], 1 }

</bundles_post_ra>
